<compile_context>
chip_gen: v7x
topology: tpu7x:2x2x1
jax: 0.10.0
libtpu: 0.0.40
codegen_flags: <defaults>
</compile_context>

<pallas_src>
import functools
import math

import jax
import jax.numpy as jnp
from jax import lax
from jax.experimental import pallas as pl
from jax.experimental.pallas import tpu as pltpu


# ---------------------------------------------------------------------------
# Projection kernels: y = x @ w_t + b   (w_t pre-transposed to (in, out))
# ---------------------------------------------------------------------------
def _linear_kernel(x_ref, w_ref, b_ref, o_ref):
    acc = jnp.dot(x_ref[...], w_ref[...], preferred_element_type=jnp.float32)
    o_ref[...] = (acc + b_ref[...].astype(jnp.float32)).astype(o_ref.dtype)


def _kv_linear_kernel(x_ref, w_ref, b_ref, k_ref, v_ref, *, out_dim):
    # One wide matmul with the concatenated K|V weight (better MXU width),
    # then split the result along lanes into the two outputs.
    acc = jnp.dot(x_ref[...], w_ref[...], preferred_element_type=jnp.float32)
    acc = acc + b_ref[...].astype(jnp.float32)
    k_ref[...] = acc[:, :out_dim].astype(k_ref.dtype)
    v_ref[...] = acc[:, out_dim:].astype(v_ref.dtype)


def linear_projection(x2d, w_t, b, *, block_rows=512):
    """x2d: (rows, in_dim), w_t: (in_dim, out_dim), b: (out_dim,)."""
    rows, in_dim = x2d.shape
    out_dim = w_t.shape[1]
    # NOTE: for v5e with hidden >= 1024, drop block_rows to 256 or raise
    # vmem_limit_bytes (resident f32 weight is double-buffered by default).
    tm = rows if rows <= block_rows else block_rows
    b2 = b.reshape(1, out_dim)
    return pl.pallas_call(
        _linear_kernel,
        out_shape=jax.ShapeDtypeStruct((rows, out_dim), x2d.dtype),
        grid_spec=pltpu.PrefetchScalarGridSpec(
            num_scalar_prefetch=0,
            grid=(pl.cdiv(rows, tm),),
            in_specs=[
                pl.BlockSpec((tm, in_dim), lambda i: (i, 0)),
                # TODO(synk): pipeline_mode=pl.Buffered(1) on the resident
                # weight/bias would halve their VMEM footprint on v7x.
                pl.BlockSpec((in_dim, out_dim), lambda i: (0, 0)),   # resident
                pl.BlockSpec((1, out_dim), lambda i: (0, 0)),        # resident
            ],
            out_specs=pl.BlockSpec((tm, out_dim), lambda i: (i, 0)),
        ),
        compiler_params=pltpu.CompilerParams(dimension_semantics=("parallel",)),
    )(x2d, w_t, b2)


def kv_linear_projection(x2d, wkv_t, bkv, out_dim, *, block_rows=512):
    """Fused K/V projection: x2d streamed once; wkv_t: (in, 2*out)."""
    rows, in_dim = x2d.shape
    tm = rows if rows <= block_rows else block_rows
    b2 = bkv.reshape(1, 2 * out_dim)
    out_sds = jax.ShapeDtypeStruct((rows, out_dim), x2d.dtype)
    return pl.pallas_call(
        functools.partial(_kv_linear_kernel, out_dim=out_dim),
        out_shape=(out_sds, out_sds),
        grid_spec=pltpu.PrefetchScalarGridSpec(
            num_scalar_prefetch=0,
            grid=(pl.cdiv(rows, tm),),
            in_specs=[
                pl.BlockSpec((tm, in_dim), lambda i: (i, 0)),
                pl.BlockSpec((in_dim, 2 * out_dim), lambda i: (0, 0)),  # resident
                pl.BlockSpec((1, 2 * out_dim), lambda i: (0, 0)),       # resident
            ],
            out_specs=(
                pl.BlockSpec((tm, out_dim), lambda i: (i, 0)),
                pl.BlockSpec((tm, out_dim), lambda i: (i, 0)),
            ),
        ),
        compiler_params=pltpu.CompilerParams(dimension_semantics=("parallel",)),
    )(x2d, wkv_t, b2)


# ---------------------------------------------------------------------------
# Cross-attention core: all heads per (batch, q-tile) grid step.
# q is pre-scaled by 1/sqrt(d) (folded into the query projection weights).
# ---------------------------------------------------------------------------
def _co_attention_kernel(q_ref, k_ref, v_ref, m_ref, o_ref, *, num_heads):
    # q_ref: (tq, hidden)   k_ref/v_ref: (Sk, hidden)  (resident per batch)
    # m_ref: (1, Sk) additive mask    o_ref: (tq, hidden) lane-dense output
    q = q_ref[...]
    k = k_ref[...]
    v = v_ref[...]
    mask = m_ref[...].astype(jnp.float32)                      # (1, Sk)
    hidden = q.shape[-1]
    d = hidden // num_heads

    ctx_heads = []
    for h in range(num_heads):                                 # static unroll
        lo, hi = h * d, (h + 1) * d
        # scores = q_h @ k_h^T (contract head dim, no materialized transpose)
        s = lax.dot_general(q[:, lo:hi], k[:, lo:hi],
                            (((1,), (1,)), ((), ())),
                            preferred_element_type=jnp.float32)  # (tq, Sk)
        s = s + mask
        # Numerically-stable softmax; normalization deferred until after p@v.
        p = jnp.exp(s - jnp.max(s, axis=-1, keepdims=True))
        denom = jnp.sum(p, axis=-1, keepdims=True)               # (tq, 1)
        # TODO(synk): nn.Dropout(attention_probs_dropout_prob) is treated as
        # inference-mode identity (no stochastic masking in this kernel).
        ctx = jnp.dot(p, v[:, lo:hi], preferred_element_type=jnp.float32)
        ctx_heads.append(ctx * pl.reciprocal(denom, approx=True))

    # Assemble all heads into a single lane-dense (tq, hidden) store.
    o_ref[...] = jnp.concatenate(ctx_heads, axis=-1).astype(o_ref.dtype)


def co_attention(q3, k3, v3, mask3, num_heads, *, block_q=512):
    """q3: (B,Sq,hidden) (pre-scaled), k3/v3: (B,Sk,hidden), mask3: (B,1,Sk)."""
    B, Sq, hidden = q3.shape
    Sk = k3.shape[1]
    tq = Sq if Sq <= block_q else block_q
    # TODO(synk): for very long s2 sequences on v7x (64 MiB VMEM), tile Sk
    # flash-style (online softmax) instead of keeping K/V fully resident.
    return pl.pallas_call(
        functools.partial(_co_attention_kernel, num_heads=num_heads),
        out_shape=jax.ShapeDtypeStruct((B, Sq, hidden), q3.dtype),
        grid_spec=pltpu.PrefetchScalarGridSpec(
            num_scalar_prefetch=0,
            grid=(B, pl.cdiv(Sq, tq)),
            in_specs=[
                pl.BlockSpec((pl.Squeezed(), tq, hidden), lambda b, i: (b, i, 0)),
                pl.BlockSpec((pl.Squeezed(), Sk, hidden), lambda b, i: (b, 0, 0)),
                pl.BlockSpec((pl.Squeezed(), Sk, hidden), lambda b, i: (b, 0, 0)),
                pl.BlockSpec((pl.Squeezed(), 1, Sk), lambda b, i: (b, 0, 0)),
            ],
            out_specs=pl.BlockSpec((pl.Squeezed(), tq, hidden),
                                   lambda b, i: (b, i, 0)),
        ),
        compiler_params=pltpu.CompilerParams(
            dimension_semantics=("parallel", "parallel")),
    )(q3, k3, v3, mask3)


# ---------------------------------------------------------------------------
# Full BertCoAttention forward
# ---------------------------------------------------------------------------
def bert_co_attention(s1_hidden, s2_hidden, s2_attention_mask, params,
                      num_heads, *, block_rows=512, block_q=512):
    """s1_hidden: (B,S1,H)  s2_hidden: (B,S2,H)  s2_attention_mask: (B,1,1,S2)
    params: dict name -> (weight(out,in), bias(out,)) in PyTorch nn.Linear layout.
    Returns context_layer: (B, S1, H)."""
    B, Sq, hidden = s1_hidden.shape
    _, Sk, _ = s2_hidden.shape
    d = hidden // num_heads
    scale = 1.0 / math.sqrt(d)

    wq, bq = params["query"]
    wk, bk = params["key"]
    wv, bv = params["value"]

    # One-time constant prep: fold 1/sqrt(d) into the query projection and
    # concatenate the K|V weights so s2 activations stream from HBM once.
    wq_t = wq.T * scale
    bq_s = bq * scale
    wkv_t = jnp.concatenate([wk.T, wv.T], axis=1)     # (hidden, 2*hidden)
    bkv = jnp.concatenate([bk, bv])                   # (2*hidden,)

    q2 = linear_projection(s1_hidden.reshape(B * Sq, hidden), wq_t, bq_s,
                           block_rows=block_rows)
    k2, v2 = kv_linear_projection(s2_hidden.reshape(B * Sk, hidden), wkv_t,
                                  bkv, hidden, block_rows=block_rows)

    # (B*S, hidden) -> (B, S, hidden): free reshapes, no HBM transposes.
    q3 = q2.reshape(B, Sq, hidden)
    k3 = k2.reshape(B, Sk, hidden)
    v3 = v2.reshape(B, Sk, hidden)
    mask3 = s2_attention_mask.reshape(B, 1, Sk)       # broadcast over heads & q

    # Output already in (B, Sq, hidden): permute(0,2,1,3)+view are implicit.
    return co_attention(q3, k3, v3, mask3, num_heads, block_q=block_q)


# ---------------------------------------------------------------------------
# Pure-JAX reference (mirrors the PyTorch module, full f32 precision)
# ---------------------------------------------------------------------------
def reference_co_attention(s1, s2, mask, params, num_heads):
    hi = lax.Precision.HIGHEST
    B, Sq, hidden = s1.shape
    Sk = s2.shape[1]
    d = hidden // num_heads

    def linear(x, wb):
        w, b = wb
        return jnp.einsum("bsh,oh->bso", x, w, precision=hi) + b

    q = linear(s1, params["query"])
    k = linear(s2, params["key"])
    v = linear(s2, params["value"])

    def split(x, S):
        return x.reshape(B, S, num_heads, d).transpose(0, 2, 1, 3)

    q, k, v = split(q, Sq), split(k, Sk), split(v, Sk)
    scores = jnp.einsum("bhqd,bhkd->bhqk", q, k, precision=hi) / math.sqrt(d)
    scores = scores + mask                       # (B,1,1,Sk) broadcasts
    probs = jax.nn.softmax(scores, axis=-1)
    ctx = jnp.einsum("bhqk,bhkd->bhqd", probs, v, precision=hi)
    return ctx.transpose(0, 2, 1, 3).reshape(B, Sq, hidden)


if __name__ == "__main__":
    key = jax.random.PRNGKey(0)
    batch, seq_s1, seq_s2, hidden, num_heads = 2, 8, 16, 32, 4

    ks = jax.random.split(key, 9)
    s1 = jax.random.normal(ks[0], (batch, seq_s1, hidden), dtype=jnp.float32)
    s2 = jax.random.normal(ks[1], (batch, seq_s2, hidden), dtype=jnp.float32)

    params = {
        "query": (0.05 * jax.random.normal(ks[2], (hidden, hidden), dtype=jnp.float32),
                  0.01 * jax.random.normal(ks[3], (hidden,), dtype=jnp.float32)),
        "key":   (0.05 * jax.random.normal(ks[4], (hidden, hidden), dtype=jnp.float32),
                  0.01 * jax.random.normal(ks[5], (hidden,), dtype=jnp.float32)),
        "value": (0.05 * jax.random.normal(ks[6], (hidden, hidden), dtype=jnp.float32),
                  0.01 * jax.random.normal(ks[7], (hidden,), dtype=jnp.float32)),
    }

    # Standard BERT extended additive mask (B, 1, 1, S2): 0 = keep, -10000 = pad.
    keep = (jax.random.uniform(ks[8], (batch, seq_s2)) > 0.25).astype(jnp.float32)
    s2_attention_mask = ((1.0 - keep) * -10000.0).reshape(batch, 1, 1, seq_s2)

    out = bert_co_attention(s1, s2, s2_attention_mask, params, num_heads)
    out = jax.block_until_ready(out)

    ref = reference_co_attention(s1, s2, s2_attention_mask, params, num_heads)
    assert out.shape == (batch, seq_s1, hidden) and out.dtype == s1.dtype
    # Default (bf16-pass) MXU precision + approx reciprocal -> looser tolerance
    # than the f32-HIGHEST reference.
    max_err = float(jnp.max(jnp.abs(out - ref)))
    assert jnp.allclose(out, ref, atol=2e-2, rtol=2e-2), max_err

    print("KERNEL_OK")
</pallas_src>

<mosaic_0001>
module attributes {stable_mosaic.version = 11 : i64} {
  func.func @_linear_kernel(%arg0: i32, %arg1: memref<16x32xf32, #tpu.memory_space<vmem>>, %arg2: memref<32x32xf32, #tpu.memory_space<vmem>>, %arg3: memref<1x32xf32, #tpu.memory_space<vmem>>, %arg4: memref<16x32xf32, #tpu.memory_space<vmem>>) attributes {dimension_semantics = [#tpu.dimension_semantics<parallel>], iteration_bounds = array<i64: 1>, scalar_prefetch = 0 : i64, scratch_operands = 0 : i64, tpu.core_type = #tpu.core_type<tc>, window_params = [{transform_indices = @transform_0, window_bounds = array<i64: 16, 32>}, {pipeline_mode = #tpu.pipeline_mode<synchronous>, transform_indices = @transform_1, window_bounds = array<i64: 32, 32>}, {pipeline_mode = #tpu.pipeline_mode<synchronous>, transform_indices = @transform_2, window_bounds = array<i64: 1, 32>}, {transform_indices = @transform_3, window_bounds = array<i64: 16, 32>}]} {
    %c0 = arith.constant 0 : index
    %c0_0 = arith.constant 0 : index
    %0 = vector.load %arg1[%c0, %c0_0] : memref<16x32xf32, #tpu.memory_space<vmem>>, vector<16x32xf32>
    %c0_1 = arith.constant 0 : index
    %c0_2 = arith.constant 0 : index
    %1 = vector.load %arg2[%c0_1, %c0_2] : memref<32x32xf32, #tpu.memory_space<vmem>>, vector<32x32xf32>
    %cst = arith.constant dense<0.000000e+00> : vector<16x32xf32>
    %2 = tpu.matmul %0, %1, %cst {dimension_numbers = #tpu.dot_dimension_numbers<[1], [0], [0], [1], [0, 0, 1, 1], [], []>} : vector<16x32xf32>, vector<32x32xf32>, vector<16x32xf32> -> vector<16x32xf32>
    %c0_3 = arith.constant 0 : index
    %c0_4 = arith.constant 0 : index
    %3 = vector.load %arg3[%c0_3, %c0_4] : memref<1x32xf32, #tpu.memory_space<vmem>>, vector<1x32xf32>
    %4 = vector.broadcast %3 : vector<1x32xf32> to vector<16x32xf32>
    %5 = arith.addf %2, %4 : vector<16x32xf32>
    %c0_5 = arith.constant 0 : index
    %c0_6 = arith.constant 0 : index
    %6 = vector.load %arg4[%c0_5, %c0_6] : memref<16x32xf32, #tpu.memory_space<vmem>>, vector<16x32xf32>
    tpu.vector_store %arg4[%c0_5, %c0_6], %5 {strides = array<i32>} : memref<16x32xf32, #tpu.memory_space<vmem>>, vector<16x32xf32>,
    return
  }
  func.func @transform_0(%arg0: i32) -> (i32, i32) {
    %c0_i32 = arith.constant 0 : i32
    %c0_i32_0 = arith.constant 0 : i32
    return %arg0, %c0_i32 : i32, i32
  }
  func.func @transform_1(%arg0: i32) -> (i32, i32) {
    %c0_i32 = arith.constant 0 : i32
    %c0_i32_0 = arith.constant 0 : i32
    %c0_i32_1 = arith.constant 0 : i32
    return %c0_i32, %c0_i32_0 : i32, i32
  }
  func.func @transform_2(%arg0: i32) -> (i32, i32) {
    %c0_i32 = arith.constant 0 : i32
    %c0_i32_0 = arith.constant 0 : i32
    %c0_i32_1 = arith.constant 0 : i32
    return %c0_i32, %c0_i32_0 : i32, i32
  }
  func.func @transform_3(%arg0: i32) -> (i32, i32) {
    %c0_i32 = arith.constant 0 : i32
    %c0_i32_0 = arith.constant 0 : i32
    return %arg0, %c0_i32 : i32, i32
  }
}

</mosaic_0001>

<bundles_post_ra>
// kernel: tpu_custom_call.1
= control target key start
LH: loop header
LB: loop body
LE: loop exit
PB: predicated region body
PF: predicated region fallthrough
CT: control target
= control target key end

     0   :  { %8 = vsyncpa [#allocation3], 0  ;;  %s340_s0 = inlined_call_operand.hbm [shape: f32[16,32], index: 0, kind: input, shape index: {}]   ;;  %s341_s1 = inlined_call_operand.hbm [shape: f32[32,32], index: 1, kind: input, shape index: {}]   ;;  %s342_s2 = inlined_call_operand.vmem [shape: f32[1,32], index: 2, kind: input, shape index: {}]   ;;  %s343_s3 = inlined_call_operand.hbm [shape: f32[16,32], index: 3, kind: output, shape index: {}]  }
   0x1   :  { %9 = vsyncpa [#allocation6], 0 }
   0x2   :  { %10 = vsyncpa [#allocation4], 0  ;;  %s263_s12 = smov [#allocation2]   ;;  %s191_s16 = scalar_lea.hbm %s340_s0, 256 }
   0x3   :  { %s16_s13 = sshll.u32 %s263_s12, 4  ;;  %p192_p0 = scmp.ne.s32.totalorder %s340_s0, %s191_s16  ;;  %s17_s13 = int_to_ptr.vmem [resolvable:$true] %s16_s13 }
   0x4   :  { %p195_p1 = scmp.lt.u32.totalorder %s191_s16, %s340_s0 }
   0x6   :  { %p197_p2 = pnand %p195_p1, %p192_p0 }
   0x8   :  { %200 = shalt.err (!%p197_p2)
}
   0x9   :  { %s201_s21 = scalar_lea.vmem %s17_s13, 256  ;;  %p206_p4 = scmp.lt.s32.totalorder %s17_s13, %s17_s13 }
   0xa   :  { %p202_p3 = scmp.ne.s32.totalorder %s17_s13, %s201_s21  ;;  %p207_p5 = scmp.lt.s32.totalorder %s201_s21, %s201_s21 }
   0xc   :  { %p208_p6 = por %p207_p5, %p206_p4 }
   0xe   :  { %p209_p7 = pnand %p208_p6, %p202_p3 }
  0x10   :  { %212 = shalt.err (!%p209_p7)
}
  0x11   :  { %s264_s22 = smov 128   ;;  %s265_s23 = smov 8  }
  0x12   :  { %22 = dma.hbm_to_vmem [thread:$0]  %s340_s0, 256, %s17_s13, [#allocation3], %s264_s22, %s264_s22, %s265_s23  }
  0x13   :  { %s266_s26 = smov [#allocation5]   ;;  %s213_s30 = scalar_lea.hbm %s341_s1, 512 }
  0x14   :  { %s28_s27 = sshll.u32 %s266_s26, 4  ;;  %p214_p8 = scmp.ne.s32.totalorder %s341_s1, %s213_s30  ;;  %s29_s27 = int_to_ptr.vmem [resolvable:$true] %s28_s27 }
  0x15   :  { %p217_p9 = scmp.lt.u32.totalorder %s213_s30, %s341_s1 }
  0x17   :  { %p219_p10 = pnand %p217_p9, %p214_p8 }
  0x19   :  { %222 = shalt.err (!%p219_p10)
}
  0x1a   :  { %s223_s8 = scalar_lea.vmem %s29_s27, 512  ;;  %p228_p12 = scmp.lt.s32.totalorder %s29_s27, %s29_s27 }
  0x1b   :  { %p224_p11 = scmp.ne.s32.totalorder %s29_s27, %s223_s8  ;;  %p229_p13 = scmp.lt.s32.totalorder %s223_s8, %s223_s8 }
  0x1d   :  { %p230_p0 = por %p229_p13, %p228_p12 }
  0x1f   :  { %p231_p1 = pnand %p230_p0, %p224_p11 }
  0x21   :  { %234 = shalt.err (!%p231_p1)
}
  0x22   :  { %34 = dma.hbm_to_vmem [thread:$0]  %s341_s1, 512, %s29_s27, [#allocation6], %s264_s22, %s264_s22, %s265_s23  }
  0x23   :  { %257 = dma.done.wait [#allocation3], 256  }
  0x24   :  { %258 = vsyncadd [#allocation3], 4294967040 }
  0x25   :  { %259 = dma.done.wait [#allocation6], 512  }
  0x26   :  { %260 = vsyncadd [#allocation6], 4294966784  ;;  %vm56_vm0 = vcmask 261120   ;;  %v45_v0 = vld [vmem:[#allocation5] sm:$0xff]  ;;  %v46_v1 = vld [vmem:[#allocation5 + $0x8] sm:$0xff]  ;;  %s267_s11 = smov [#allocation7]  }
  0x27   :  { %v47_v2 = vld [vmem:[#allocation5 + $0x10] sm:$0xff]  ;;  %v178_v3 = vpack.c.bf16 %v46_v1, %v45_v0  ;;  %v48_v4 = vld [vmem:[#allocation5 + $0x18] sm:$0xff]  ;;  %s145_s12 = sshll.u32 %s267_s11, 4  ;;  %s146_s12 = int_to_ptr.vmem [resolvable:$true] %s145_s12 }
  0x28   :  { %v43_v5 = vld [vmem:[#allocation2] sm:$0xff]  ;;  %v182_v6 = vpack.c.bf16 %v48_v4, %v47_v2  ;;  %v44_v7 = vld [vmem:[#allocation2 + $0x8] sm:$0xff]  ;;  %s235_s13 = scalar_lea.vmem %s146_s12, 256  ;;  %p240_p3 = scmp.lt.s32.totalorder %s146_s12, %s146_s12 }
  0x29   :  { %175 = vmatprep.mubr.msk.f32.mxu0 %vm56_vm0, %v43_v5  ;;  %179 = vmatprep.subr.bf16.mxu0 %v178_v3  ;;  %v158_v8 = vld [vmem:[%s342_s2] ss:$0 sm:$0xff]  ;;  %p236_p2 = scmp.ne.s32.totalorder %s146_s12, %s235_s13  ;;  %p241_p4 = scmp.lt.s32.totalorder %s235_s13, %s235_s13 }
  0x2a   :  { %181 = vmatpush3.bf16.msra.mxu0 %v178_v3 }
  0x2b   :  { %183 = vmatprep.subr.bf16.mxu0 %v182_v6  ;;  %p242_p5 = por %p241_p4, %p240_p3 }
  0x2d   :  { %p243_p6 = pnand %p242_p5, %p236_p2 }
  0x2e   :  { %185 = vmatpush3.bf16.msra.mxu0 %v182_v6 }
  0x31   :  { %176 = vmatmul.mubr.msk.f32.vlgmr.msra.gmra.mrb[0].mxu0 %vm56_vm0, %v44_v7 }
 0x104   :  { %v177_v9 = vpop.f32.mrb[0].mxu0 }
 0x105   :  { %v135_v10 = vadd.f32 %v177_v9, %v158_v8  ;;  %v129_v11 = vpop.f32.mrb[1].mxu0 }
 0x106   :  { %v130_v12 = vadd.f32 %v158_v8, %v129_v11 }
 0x107   :  { %139 = vst.msk [vmem:[#allocation7 + $0x8] sm:$0xff] %vm56_vm0, %v135_v10 }
 0x108   :  { %138 = vst.msk [vmem:[#allocation7] sm:$0xff] %vm56_vm0, %v130_v12 }
 0x109   :  { %246 = shalt.err (!%p243_p6)
}
 0x10a   :  { %s247_s15 = scalar_lea.hbm %s343_s3, 256 }
 0x10b   :  { %p248_p7 = scmp.ne.s32.totalorder %s343_s3, %s247_s15  ;;  %p251_p8 = scmp.lt.u32.totalorder %s247_s15, %s343_s3 }
 0x10d   :  { %p253_p9 = pnand %p251_p8, %p248_p7 }
 0x10f   :  { %256 = shalt.err (!%p253_p9)
}
 0x110   :  { %151 = dma.vmem_to_hbm [thread:$0]  %s146_s12, 256, %s343_s3, [#allocation4], %s264_s22, %s264_s22, %s265_s23  }
 0x111   :  { %261 = dma.done.wait [#allocation4], 256  }
 0x112   :  { %262 = vsyncadd [#allocation4], 4294967040 }
 0x113   :  { %155 = vsyncpa [#allocation3], 1 }
 0x114   :  { %156 = vsyncpa [#allocation6], 1 }
 0x115   :  { %157 = vsyncpa [#allocation4], 1 }

</bundles_post_ra>
